<compile_context>
chip_gen: v5e
topology: v5e:2x2
jax: 0.10.0
libtpu: 0.0.40
codegen_flags: <defaults>
</compile_context>

<pallas_src>
import functools

import numpy as np
import jax
import jax.numpy as jnp
from jax.experimental import pallas as pl
from jax.experimental.pallas import tpu as pltpu


# ----------------------------------------------------------------------------
# Geometry helpers (numpy, parameter/buffer setup only -- not the hot path)
# ----------------------------------------------------------------------------
def z_rots(gammas):
    na = len(gammas)
    Rz = np.zeros([na, 9], dtype=np.float32)
    calpha = np.cos(gammas)
    salpha = np.sin(gammas)
    Rz[:, 0] = calpha
    Rz[:, 1] = -salpha
    Rz[:, 3] = salpha
    Rz[:, 4] = calpha
    Rz[:, 8] = 1
    return Rz.reshape(-1, 3, 3)


def _rot_x(t):
    c, s = np.cos(t), np.sin(t)
    return np.array([[1, 0, 0], [0, c, -s], [0, s, c]], dtype=np.float32)


def _rot_y(t):
    c, s = np.cos(t), np.sin(t)
    return np.array([[c, 0, s], [0, 1, 0], [-s, 0, c]], dtype=np.float32)


def get_relativeV_index(Rs, vs):
    """Rs: [nr,3,3], vs: [nv,3].  For each rotation, find the permutation of vs.
    trace_idx_ori[r, i] = index j of the vertex nearest to Rs[r] @ vs[i]
    trace_idx_rot       = inverse permutation (per rotation)."""
    rotated = np.einsum('rij,vj->rvi', Rs, vs)                       # [nr, nv, 3]
    d2 = ((rotated[:, :, None, :] - vs[None, None, :, :]) ** 2).sum(-1)
    trace_idx_ori = d2.argmin(-1).astype(np.int64)                   # [nr, nv]
    nr, nv = trace_idx_ori.shape
    trace_idx_rot = np.empty_like(trace_idx_ori)
    for r in range(nr):
        trace_idx_rot[r, trace_idx_ori[r]] = np.arange(nv)
    return trace_idx_ori, trace_idx_rot


def get_idx_map(kernel_pts, anchor_vs, anchor_Rzs):
    """Group (kernel, anchor) pairs into orbits of the z-rotation quotient group."""
    trace_idxv_ori, _ = get_relativeV_index(anchor_Rzs, kernel_pts)
    trace_idxr_ori, _ = get_relativeV_index(anchor_Rzs, anchor_vs)
    K = kernel_pts.shape[0]
    A = anchor_vs.shape[0]
    NZ = anchor_Rzs.shape[0]
    idx_map = np.empty(K * A, dtype=np.int64)
    assigned = set()
    using_idx = 0
    for k in range(K):
        k_idxs = trace_idxv_ori[:, k]
        for a in range(A):
            a_idxs = trace_idxr_ori[:, a]
            new_assigned = False
            for az in range(NZ):
                idx_flat = int(k_idxs[az]) * A + int(a_idxs[az])
                if idx_flat not in assigned:
                    idx_map[idx_flat] = using_idx
                    assigned.add(idx_flat)
                    new_assigned = True
            if new_assigned:
                using_idx += 1
    assert len(assigned) == K * A, f'{len(assigned)}, {K}, {A}'
    return idx_map, using_idx


# ----------------------------------------------------------------------------
# Pallas kernel: fused relayout + matmul on the native x layout
# ----------------------------------------------------------------------------
def _s2conv_kernel(x_ref, w_ref, o_ref):
    # x_ref: (1, C, K, tp, A) f32 activations in native layout
    # w_ref: (DRp, C*K*A)     effective weight (compute dtype, e.g. bf16)
    # o_ref: (1, DRp, tp)     f32 output slab tile
    x = x_ref[0]                                     # (C, K, tp, A)
    C, K, tp, A = x.shape
    # Per-tile relayout in VMEM: (C,K,tp,A) -> (C*K*A, tp).
    xt = x.reshape(C * K, tp, A)                     # merge leading dims (free)
    xt = jnp.transpose(xt, (0, 2, 1))                # (CK, A, tp): minor-dims transpose
    xt = xt.reshape(C * K * A, tp)                   # merge leading dims
    xt = xt.astype(w_ref.dtype)                      # f32 -> bf16 feeding the MXU
    o_ref[0] = jnp.dot(
        w_ref[...], xt, preferred_element_type=jnp.float32
    ).astype(o_ref.dtype)


def s2conv_pallas(x, w_mat, *, tp):
    """x: [B, C, K, P, A] (native layout), w_mat: [DRp, C*K*A].
    Returns a lane-dense slab [B, DRp, P] with slab[b, d*A + r, p]."""
    B, C, K, P, A = x.shape
    DRp, CKA = w_mat.shape
    assert CKA == C * K * A, (CKA, C, K, A)
    n_pt = pl.cdiv(P, tp)                            # no divisibility assert

    # VMEM budget: double-buffered x/out tiles + resident weight block.
    x_tile_b = C * K * tp * A * x.dtype.itemsize
    o_tile_b = DRp * tp * 4
    w_b = DRp * CKA * w_mat.dtype.itemsize
    vmem_need = 2 * x_tile_b + 2 * o_tile_b + 2 * w_b + (2 << 20)
    cp_kwargs = dict(dimension_semantics=("parallel", "parallel"))
    if vmem_need > (16 << 20):                       # smallest default scoped limit (v5e)
        cp_kwargs["vmem_limit_bytes"] = int(min(vmem_need, 64 << 20))

    return pl.pallas_call(
        _s2conv_kernel,
        out_shape=jax.ShapeDtypeStruct((B, DRp, P), jnp.float32),
        grid=(B, n_pt),
        in_specs=[
            pl.BlockSpec((1, C, K, tp, A), lambda b, p: (b, 0, 0, p, 0)),
            pl.BlockSpec((DRp, CKA), lambda b, p: (0, 0)),   # resident weight
        ],
        out_specs=pl.BlockSpec((1, DRp, tp), lambda b, p: (b, 0, p)),
        compiler_params=pltpu.CompilerParams(**cp_kwargs),
    )(x, w_mat)


@functools.partial(jax.jit, static_argnames=("dim_out", "anchor_size", "p_tile"))
def s2conv_forward(x, w_mat, *, dim_out, anchor_size, p_tile):
    """Full forward: Pallas slab + small output axis swap to the PyTorch layout."""
    B, C, K, P, A = x.shape
    tp = P if P <= p_tile else p_tile                # single tile for small P
    slab = s2conv_pallas(x, w_mat, tp=tp)            # [B, DRp, P]
    DR = dim_out * anchor_size
    out = slab[:, :DR, :].reshape(B, dim_out, anchor_size, P)
    return jnp.transpose(out, (0, 1, 3, 2))          # [B, D, P, R]


# ----------------------------------------------------------------------------
# BasicS2ConvV2 in JAX + Pallas
# ----------------------------------------------------------------------------
class BasicS2ConvV2Pallas:
    def __init__(self, dim_in, dim_out, kernel_size, anchor_size,
                 quotient_size, anchors, kernels, anchor_vs, key,
                 compute_dtype=jnp.bfloat16, p_tile=256):
        self.dim_in = dim_in
        self.dim_out = dim_out
        self.kernel_size = kernel_size
        self.anchor_size = anchor_size
        self.compute_dtype = compute_dtype
        self.p_tile = int(p_tile)

        trace_idx_ori, trace_idx_rot = get_relativeV_index(anchors, anchor_vs)     # [A, A]
        trace_idxv_ori, trace_idxv_rot = get_relativeV_index(anchors, kernels)     # [A, K]

        gammas = np.linspace(0, 2 * np.pi, quotient_size, endpoint=False,
                             dtype=np.float32)
        anchor_Rzs = z_rots(gammas)
        idx_map, n_param_effective = get_idx_map(kernels, anchor_vs, anchor_Rzs)
        self.n_param_effective = n_param_effective
        if anchor_size == 6:
            assert n_param_effective in (15, 27), n_param_effective
            assert kernel_size in (7, 15), kernel_size

        # Deterministic xavier-normal init, gain = sqrt(2) (relu), torch fan conv.
        fan_in = dim_in * n_param_effective
        fan_out = dim_out * n_param_effective
        std = np.sqrt(2.0) * np.sqrt(2.0 / (fan_in + fan_out))
        self.W = std * jax.random.normal(
            key, (dim_out, dim_in, n_param_effective), dtype=jnp.float32)

        K, A = kernel_size, anchor_size
        self.idx_map = jnp.asarray(idx_map, dtype=jnp.int32)                        # [K*A]
        # idxs_k[k, a, r] = trace_idxv_rot[r, k]   (values in [0, K))
        self.idxs_k = jnp.asarray(
            np.broadcast_to(trace_idxv_rot.T[:, None, :], (K, A, A)).astype(np.int32))
        # idxs_a[k, a, r] = trace_idx_rot[r, a]    (values in [0, A))
        self.idxs_a = jnp.asarray(
            np.broadcast_to(trace_idx_rot.T[None, :, :], (K, A, A)).astype(np.int32))

        # --- Hoisted weight preparation (static at inference) ------------------
        D, C = dim_out, dim_in
        W_eff = self._build_W_eff()                                                 # [D,C,K,A,R] f32
        self.W_eff = W_eff
        DR = D * A
        DRp = ((DR + 7) // 8) * 8                                                   # sublane-align rows
        # rows = d*R + r, cols = (c*K + k)*A + a
        w_mat = jnp.transpose(W_eff, (0, 4, 1, 2, 3)).reshape(DR, C * K * A)
        if DRp != DR:
            w_mat = jnp.pad(w_mat, ((0, DRp - DR), (0, 0)))
        self.w_mat = w_mat.astype(compute_dtype)                                    # bf16 weight, once

    def _build_W_eff(self):
        D, C, K, A = self.dim_out, self.dim_in, self.kernel_size, self.anchor_size
        Wbase = self.W[:, :, self.idx_map].reshape(D, C, K, A)                      # [D,C,K,A]
        # torch.gather along dim 2:  W1[d,c,k,a,r] = Wbase[d,c, idxs_k[k,a,r], a]
        a_idx = jnp.broadcast_to(jnp.arange(A)[None, :, None], (K, A, A))
        W1 = Wbase[:, :, self.idxs_k, a_idx]                                        # [D,C,K,A,R]
        # torch.gather along dim 3:  W2[d,c,k,a,r] = W1[d,c,k, idxs_a[k,a,r], r]
        k_idx = jnp.broadcast_to(jnp.arange(K)[:, None, None], (K, A, A))
        r_idx = jnp.broadcast_to(jnp.arange(A)[None, None, :], (K, A, A))
        W2 = W1[:, :, k_idx, self.idxs_a, r_idx]                                    # [D,C,K,A,R]
        return W2

    def __call__(self, x):
        # x: [B, C, K, P, A]  ->  out: [B, D, P, R]  (R == anchor_size)
        return s2conv_forward(x, self.w_mat, dim_out=self.dim_out,
                              anchor_size=self.anchor_size, p_tile=self.p_tile)


if __name__ == "__main__":
    # Octahedral configuration: anchor_size=6, kernel_size=7, quotient_size=4.
    anchor_vs = np.array(
        [[1, 0, 0], [-1, 0, 0], [0, 1, 0], [0, -1, 0], [0, 0, 1], [0, 0, -1]],
        dtype=np.float32)
    kernels = np.concatenate(
        [np.zeros((1, 3), dtype=np.float32), anchor_vs], axis=0)                    # 7 kernel pts
    # 6 coset-representative rotations mapping +z onto each anchor direction.
    anchors = np.stack([
        _rot_y(np.pi / 2),    # z -> +x
        _rot_y(-np.pi / 2),   # z -> -x
        _rot_x(-np.pi / 2),   # z -> +y
        _rot_x(np.pi / 2),    # z -> -y
        np.eye(3, dtype=np.float32),
        _rot_x(np.pi),        # z -> -z
    ]).astype(np.float32)

    dim_in, dim_out = 4, 8
    kernel_size, anchor_size, quotient_size = 7, 6, 4
    B, P = 2, 16

    key = jax.random.PRNGKey(0)
    k_w, k_x = jax.random.split(key)

    module = BasicS2ConvV2Pallas(dim_in, dim_out, kernel_size, anchor_size,
                                 quotient_size, anchors, kernels, anchor_vs, k_w)

    # x: [b, c1, k, p, a]
    x = jax.random.normal(
        k_x, (B, dim_in, kernel_size, P, anchor_size), dtype=jnp.float32)

    out = module(x)
    out = jax.block_until_ready(out)
    assert out.shape == (B, dim_out, P, anchor_size), out.shape

    # Reference with the same bf16-quantized operands, f32 accumulation (the only
    # remaining difference vs. the kernel is summation order).
    w_q = module.W_eff.astype(jnp.bfloat16).astype(jnp.float32)
    x_q = x.astype(jnp.bfloat16).astype(jnp.float32)
    ref = jnp.einsum('dckar,bckpa->bdpr', w_q, x_q,
                     precision=jax.lax.Precision.HIGHEST)
    err = float(jnp.max(jnp.abs(out - ref)))
    assert err < 1e-2, err

    print("KERNEL_OK")
</pallas_src>

<mosaic_0001>
module attributes {stable_mosaic.version = 11 : i64} {
  func.func @_s2conv_kernel(%arg0: i32, %arg1: i32, %arg2: memref<1x4x7x16x6xf32, #tpu.memory_space<vmem>>, %arg3: memref<48x168xbf16, #tpu.memory_space<vmem>>, %arg4: memref<1x48x16xf32, #tpu.memory_space<vmem>>) attributes {dimension_semantics = [#tpu.dimension_semantics<parallel>, #tpu.dimension_semantics<parallel>], iteration_bounds = array<i64: 2, 1>, scalar_prefetch = 0 : i64, scratch_operands = 0 : i64, tpu.core_type = #tpu.core_type<tc>, window_params = [{transform_indices = @transform_0, window_bounds = array<i64: 1, 4, 7, 16, 6>}, {pipeline_mode = #tpu.pipeline_mode<synchronous>, transform_indices = @transform_1, window_bounds = array<i64: 48, 168>}, {transform_indices = @transform_2, window_bounds = array<i64: 1, 48, 16>}]} {
    %c0 = arith.constant 0 : index
    %c0_0 = arith.constant 0 : index
    %c0_1 = arith.constant 0 : index
    %c0_2 = arith.constant 0 : index
    %c0_3 = arith.constant 0 : index
    %0 = vector.load %arg2[%c0, %c0_0, %c0_1, %c0_2, %c0_3] : memref<1x4x7x16x6xf32, #tpu.memory_space<vmem>>, vector<1x4x7x16x6xf32>
    %1 = vector.shape_cast %0 : vector<1x4x7x16x6xf32> to vector<4x7x16x6xf32>
    %2 = vector.shape_cast %1 : vector<4x7x16x6xf32> to vector<28x16x6xf32>
    %3 = tpu.transpose %2, [0, 2, 1] : vector<28x16x6xf32> -> vector<28x6x16xf32>
    %4 = vector.shape_cast %3 : vector<28x6x16xf32> to vector<168x16xf32>
    %5 = arith.truncf %4 : vector<168x16xf32> to vector<168x16xbf16>
    %c0_4 = arith.constant 0 : index
    %c0_5 = arith.constant 0 : index
    %6 = vector.load %arg3[%c0_4, %c0_5] : memref<48x168xbf16, #tpu.memory_space<vmem>>, vector<48x168xbf16>
    %cst = arith.constant dense<0.000000e+00> : vector<48x16xf32>
    %7 = tpu.matmul %6, %5, %cst {dimension_numbers = #tpu.dot_dimension_numbers<[1], [0], [0], [1], [0, 0, 1, 1], [], []>} : vector<48x168xbf16>, vector<168x16xbf16>, vector<48x16xf32> -> vector<48x16xf32>
    %c0_6 = arith.constant 0 : index
    %c0_7 = arith.constant 0 : index
    %c0_8 = arith.constant 0 : index
    %8 = vector.load %arg4[%c0_6, %c0_7, %c0_8] : memref<1x48x16xf32, #tpu.memory_space<vmem>>, vector<1x48x16xf32>
    %9 = vector.shape_cast %8 : vector<1x48x16xf32> to vector<48x16xf32>
    %10 = vector.shape_cast %7 : vector<48x16xf32> to vector<1x48x16xf32>
    tpu.vector_store %arg4[%c0_6, %c0_7, %c0_8], %10 {strides = array<i32>} : memref<1x48x16xf32, #tpu.memory_space<vmem>>, vector<1x48x16xf32>,
    return
  }
  func.func @transform_0(%arg0: i32, %arg1: i32) -> (i32, i32, i32, i32, i32) {
    %c0_i32 = arith.constant 0 : i32
    %c0_i32_0 = arith.constant 0 : i32
    %c0_i32_1 = arith.constant 0 : i32
    %c0_i32_2 = arith.constant 0 : i32
    return %arg0, %c0_i32, %c0_i32_0, %arg1, %c0_i32_1 : i32, i32, i32, i32, i32
  }
  func.func @transform_1(%arg0: i32, %arg1: i32) -> (i32, i32) {
    %c0_i32 = arith.constant 0 : i32
    %c0_i32_0 = arith.constant 0 : i32
    %c0_i32_1 = arith.constant 0 : i32
    return %c0_i32, %c0_i32_0 : i32, i32
  }
  func.func @transform_2(%arg0: i32, %arg1: i32) -> (i32, i32, i32) {
    %c0_i32 = arith.constant 0 : i32
    %c0_i32_0 = arith.constant 0 : i32
    return %arg0, %c0_i32, %arg1 : i32, i32, i32
  }
}

</mosaic_0001>

<bundles_post_ra>
// kernel: s2conv_forward.1
= control target key start
LH: loop header
LB: loop body
LE: loop exit
PB: predicated region body
PF: predicated region fallthrough
CT: control target
= control target key end

     0   :  { %s1670_s9 = smov 0   ;;  %s1672_s10 = smov 0   ;;  %s1843_s0 = inlined_call_operand.vmem [shape: f32[2,4,7,16,6], index: 0, kind: input, shape index: {}]   ;;  %s1844_s1 = inlined_call_operand.vmem [shape: bf16[48,168], index: 1, kind: input, shape index: {}]   ;;  %s1845_s2 = inlined_call_operand.vmem [shape: f32[2,48,16], index: 2, kind: output, shape index: {}]  }
   0x1   :  { %s1674_s11 = smov 0  }
   0x2 LB: > { %s24_s12 = sadd.s32 1, %s1649_s10  ;;  %p1550_p0 = scmp.ge.s32.totalorder %s1653_s11, 1  ;;  %s1653_s11 = sphi %s1674_s11, %s12_s11   ;;  %s1649_s10 = sphi %s1672_s10, %s1847_s10   ;;  %s1645_s9 = sphi %s1670_s9, %s1846_s9  }
   0x3   : > { %p26_p1 = scmp.ge.s32.totalorder %s24_s12, 2  ;;  %p133_p2 = scmp.lt.s32.totalorder %s1653_s11, 3 }
   0x5   : > { %s1849_s12 = smov (%p26_p1, %s24_s12), 0  ;;  %p134_p3 = pnand %p1550_p0, %p133_p2 }
   0x6   : > { %p163_p4 = scmp.lt.s32.totalorder (!%p134_p3), %s1645_s9, 1 }
   0x7   : > { %137 = sbr.rel (%p134_p3) target bundleno = 520 (0x208), region = 28 }
   0xc   : > { %s1851_s9 = smov (!%p163_p4, %s1645_s9), 1  ;;  %vm1404_vm0 = vcmask 1043456   ;;  %vm1394_vm1 = vcmask 326656   ;;  %vm1456_vm2 = vcmask 130048  }
   0xd   : > { %s1604_s13 = smul.u32 448, %s1851_s9 }
   0xe   : > { %s1605_s17 = smul.u32 48, %s1851_s9 }
   0xf   : > { %s1694_s16 = scalar_lea.vmem %s1843_s0, %s1604_s13 }
  0x10   : > { %v183_v0 = vld [vmem:[%s1694_s16 + $0x10] sm:$0xff]  ;;  %v181_v1 = vld [vmem:[%s1694_s16] sm:$0xff]  ;;  %v184_v3 = vld [vmem:[%s1694_s16 + $0x18] sm:$0xff]  ;;  %s179_s20 = scalar_lea.vmem %s1845_s2, %s1605_s17 }
  0x11   : > { %269 = vxpose.xlu1.b32.start [1/2] (short) (narrow) %v183_v0, 8  ;;  %237 = vxpose.xlu0.b32.start [1/2] (short) (narrow) %v181_v1, 8  ;;  %v185_v2 = vld [vmem:[%s1694_s16 + $0x20] sm:$0xff]  ;;  %v182_v4 = vld [vmem:[%s1694_s16 + $0x8] sm:$0xff]  ;;  %v191_v6 = vld [vmem:[%s1694_s16 + $0x50] sm:$0xff] }
  0x12   : > { %301 = vxpose.xlu2.b32.start [1/2] (short) (narrow) %v185_v2, 8  ;;  %v186_v5 = vld [vmem:[%s1694_s16 + $0x28] sm:$0xff]  ;;  %v187_v7 = vld [vmem:[%s1694_s16 + $0x30] sm:$0xff]  ;;  %v193_v8 = vld [vmem:[%s1694_s16 + $0x60] sm:$0xff] }
  0x13   : > { %v192_v9 = vld [vmem:[%s1694_s16 + $0x58] sm:$0xff]  ;;  %v194_v11 = vld [vmem:[%s1694_s16 + $0x68] sm:$0xff]  ;;  %v197_v12 = vld [vmem:[%s1694_s16 + $0x80] sm:$0xff] }
  0x14   : > { %v188_v10 = vld [vmem:[%s1694_s16 + $0x38] sm:$0xff]  ;;  %v189_v13 = vld [vmem:[%s1694_s16 + $0x40] sm:$0xff]  ;;  %v199_v14 = vld [vmem:[%s1694_s16 + $0x90] sm:$0xff] }
  0x15   : > { %v198_v15 = vld [vmem:[%s1694_s16 + $0x88] sm:$0xff]  ;;  %v200_v17 = vld [vmem:[%s1694_s16 + $0x98] sm:$0xff]  ;;  %v201_v18 = vld [vmem:[%s1694_s16 + $0xa0] sm:$0xff] }
  0x16   : > { %v190_v16 = vld [vmem:[%s1694_s16 + $0x48] sm:$0xff]  ;;  %v195_v19 = vld [vmem:[%s1694_s16 + $0x70] sm:$0xff]  ;;  %v196_v22 = vld [vmem:[%s1694_s16 + $0x78] sm:$0xff] }
  0x17   : > { %v203_v20 = vld [vmem:[%s1694_s16 + $0xb0] sm:$0xff]  ;;  %v202_v21 = vld [vmem:[%s1694_s16 + $0xa8] sm:$0xff]  ;;  %v204_v23 = vld [vmem:[%s1694_s16 + $0xb8] sm:$0xff] }
  0x18   : > { %v209_v24 = vld [vmem:[%s1694_s16 + $0xe0] sm:$0xff]  ;;  %v207_v25 = vld [vmem:[%s1694_s16 + $0xd0] sm:$0xff]  ;;  %v210_v27 = vld [vmem:[%s1694_s16 + $0xe8] sm:$0xff] }
  0x19   : > { %270 = vxpose.xlu1.b32.end [2/2] (short) (narrow) %v184_v3, 8  ;;  %238 = vxpose.xlu0.b32.end [2/2] (short) (narrow) %v182_v4, 8  ;;  %v205_v26 = vld [vmem:[%s1694_s16 + $0xc0] sm:$0xff]  ;;  %v208_v28 = vld [vmem:[%s1694_s16 + $0xd8] sm:$0xff]  ;;  %v206_v29 = vld [vmem:[%s1694_s16 + $0xc8] sm:$0xff] }
  0x1a   : > { %302 = vxpose.xlu2.b32.end [2/2] (short) (narrow) %v186_v5, 8  ;;  %v215_v30 = vld [vmem:[%s1694_s16 + $0x110] sm:$0xff]  ;;  %v213_v31 = vld [vmem:[%s1694_s16 + $0x100] sm:$0xff]  ;;  %v216_v33 = vld [vmem:[%s1694_s16 + $0x118] sm:$0xff] }
  0x1b   : > { %v211_v32 = vld [vmem:[%s1694_s16 + $0xf0] sm:$0xff]  ;;  %v214_v34 = vld [vmem:[%s1694_s16 + $0x108] sm:$0xff]  ;;  %v212_v35 = vld [vmem:[%s1694_s16 + $0xf8] sm:$0xff] }
  0x1c   : > { %v219_v36 = vld [vmem:[%s1694_s16 + $0x130] sm:$0xff]  ;;  %v217_v37 = vld [vmem:[%s1694_s16 + $0x120] sm:$0xff]  ;;  %v220_v39 = vld [vmem:[%s1694_s16 + $0x138] sm:$0xff] }
  0x1d   : > { %v223_v38 = vld [vmem:[%s1694_s16 + $0x150] sm:$0xff]  ;;  %v218_v40 = vld [vmem:[%s1694_s16 + $0x128] sm:$0xff]  ;;  %v224_v41 = vld [vmem:[%s1694_s16 + $0x158] sm:$0xff] }
  0x1e   : > { %v221_v42 = vld [vmem:[%s1694_s16 + $0x140] sm:$0xff]  ;;  %v222_v45 = vld [vmem:[%s1694_s16 + $0x148] sm:$0xff]  ;;  %v227_v48 = vld [vmem:[%s1694_s16 + $0x170] sm:$0xff] }
  0x1f   : > { %v225_v43 = vld [vmem:[%s1694_s16 + $0x160] sm:$0xff]  ;;  %v226_v46 = vld [vmem:[%s1694_s16 + $0x168] sm:$0xff]  ;;  %v231_v49 = vld [vmem:[%s1694_s16 + $0x190] sm:$0xff] }
  0x20   : > { %v229_v44 = vld [vmem:[%s1694_s16 + $0x180] sm:$0xff]  ;;  %v230_v47 = vld [vmem:[%s1694_s16 + $0x188] sm:$0xff]  ;;  %v228_v51 = vld [vmem:[%s1694_s16 + $0x178] sm:$0xff] }
  0x21   : > { %397 = vxpose.xlu1.b32.start [1/2] (short) (narrow) %v191_v6, 8  ;;  %333 = vxpose.xlu0.b32.start [1/2] (short) (narrow) %v187_v7, 8  ;;  %v233_v50 = vld [vmem:[%s1694_s16 + $0x1a0] sm:$0xff]  ;;  %v232_v52 = vld [vmem:[%s1694_s16 + $0x198] sm:$0xff]  ;;  %v234_v53 = vld [vmem:[%s1694_s16 + $0x1a8] sm:$0xff] }
  0x22   : > { %429 = vxpose.xlu2.b32.start [1/2] (short) (narrow) %v193_v8, 8  ;;  %v235_v54 = vld [vmem:[%s1694_s16 + $0x1b0] sm:$0xff]  ;;  %v236_v55 = vld [vmem:[%s1694_s16 + $0x1b8] sm:$0xff] }
  0x29   : > { %398 = vxpose.xlu1.b32.end [2/2] (short) (narrow) %v192_v9, 8  ;;  %334 = vxpose.xlu0.b32.end [2/2] (short) (narrow) %v188_v10, 8 }
  0x2a   : > { %430 = vxpose.xlu2.b32.end [2/2] (short) (narrow) %v194_v11, 8 }
  0x31   : > { %493 = vxpose.xlu1.b32.start [1/2] (short) (narrow) %v197_v12, 8  ;;  %365 = vxpose.xlu0.b32.start [1/2] (short) (narrow) %v189_v13, 8 }
  0x32   : > { %525 = vxpose.xlu2.b32.start [1/2] (short) (narrow) %v199_v14, 8 }
  0x39   : > { %494 = vxpose.xlu1.b32.end [2/2] (short) (narrow) %v198_v15, 8  ;;  %366 = vxpose.xlu0.b32.end [2/2] (short) (narrow) %v190_v16, 8 }
  0x3a   : > { %526 = vxpose.xlu2.b32.end [2/2] (short) (narrow) %v200_v17, 8 }
  0x41   : > { %557 = vxpose.xlu1.b32.start [1/2] (short) (narrow) %v201_v18, 8  ;;  %461 = vxpose.xlu0.b32.start [1/2] (short) (narrow) %v195_v19, 8 }
  0x42   : > { %589 = vxpose.xlu2.b32.start [1/2] (short) (narrow) %v203_v20, 8 }
  0x49   : > { %558 = vxpose.xlu1.b32.end [2/2] (short) (narrow) %v202_v21, 8  ;;  %462 = vxpose.xlu0.b32.end [2/2] (short) (narrow) %v196_v22, 8 }
  0x4a   : > { %590 = vxpose.xlu2.b32.end [2/2] (short) (narrow) %v204_v23, 8 }
  0x51   : > { %685 = vxpose.xlu1.b32.start [1/2] (short) (narrow) %v209_v24, 8  ;;  %653 = vxpose.xlu0.b32.start [1/2] (short) (narrow) %v207_v25, 8 }
  0x52   : > { %621 = vxpose.xlu2.b32.start [1/2] (short) (narrow) %v205_v26, 8 }
  0x59   : > { %686 = vxpose.xlu1.b32.end [2/2] (short) (narrow) %v210_v27, 8  ;;  %654 = vxpose.xlu0.b32.end [2/2] (short) (narrow) %v208_v28, 8 }
  0x5a   : > { %622 = vxpose.xlu2.b32.end [2/2] (short) (narrow) %v206_v29, 8 }
  0x61   : > { %781 = vxpose.xlu1.b32.start [1/2] (short) (narrow) %v215_v30, 8  ;;  %749 = vxpose.xlu0.b32.start [1/2] (short) (narrow) %v213_v31, 8 }
  0x62   : > { %717 = vxpose.xlu2.b32.start [1/2] (short) (narrow) %v211_v32, 8 }
  0x69   : > { %782 = vxpose.xlu1.b32.end [2/2] (short) (narrow) %v216_v33, 8  ;;  %750 = vxpose.xlu0.b32.end [2/2] (short) (narrow) %v214_v34, 8 }
  0x6a   : > { %718 = vxpose.xlu2.b32.end [2/2] (short) (narrow) %v212_v35, 8 }
  0x71   : > { %845 = vxpose.xlu1.b32.start [1/2] (short) (narrow) %v219_v36, 8  ;;  %813 = vxpose.xlu0.b32.start [1/2] (short) (narrow) %v217_v37, 8 }
  0x72   : > { %909 = vxpose.xlu2.b32.start [1/2] (short) (narrow) %v223_v38, 8 }
  0x79   : > { %846 = vxpose.xlu1.b32.end [2/2] (short) (narrow) %v220_v39, 8  ;;  %814 = vxpose.xlu0.b32.end [2/2] (short) (narrow) %v218_v40, 8 }
  0x7a   : > { %910 = vxpose.xlu2.b32.end [2/2] (short) (narrow) %v224_v41, 8 }
  0x81   : > { %877 = vxpose.xlu1.b32.start [1/2] (short) (narrow) %v221_v42, 8  ;;  %941 = vxpose.xlu0.b32.start [1/2] (short) (narrow) %v225_v43, 8 }
  0x82   : > { %1005 = vxpose.xlu2.b32.start [1/2] (short) (narrow) %v229_v44, 8 }
  0x89   : > { %878 = vxpose.xlu1.b32.end [2/2] (short) (narrow) %v222_v45, 8  ;;  %942 = vxpose.xlu0.b32.end [2/2] (short) (narrow) %v226_v46, 8 }
  0x8a   : > { %1006 = vxpose.xlu2.b32.end [2/2] (short) (narrow) %v230_v47, 8 }
  0x91   : > { %973 = vxpose.xlu1.b32.start [1/2] (short) (narrow) %v227_v48, 8  ;;  %1037 = vxpose.xlu0.b32.start [1/2] (short) (narrow) %v231_v49, 8 }
  0x92   : > { %1069 = vxpose.xlu2.b32.start [1/2] (short) (narrow) %v233_v50, 8 }
  0x99   : > { %974 = vxpose.xlu1.b32.end [2/2] (short) (narrow) %v228_v51, 8  ;;  %1038 = vxpose.xlu0.b32.end [2/2] (short) (narrow) %v232_v52, 8 }
  0x9a   : > { %1070 = vxpose.xlu2.b32.end [2/2] (short) (narrow) %v234_v53, 8 }
  0xa1   : > { %1101 = vxpose.xlu0.b32.start [1/2] (short) (narrow) %v235_v54, 8 }
  0xa9   : > { %1102 = vxpose.xlu0.b32.end [2/2] (short) (narrow) %v236_v55, 8 }
  0xab   : > { %v317_v56 = vpop.trf.xlu2 }
  0xac   : > { %v1165_v57 = vrot.slane %v317_v56, 2  ;;  %1229 = vst [vmem:[#allocation1 + $0x22] ss:$4 sm:$0xff] %v317_v56  ;;  %v1166_v0 = vrot.slane %v317_v56, 4 }
  0xae   : > { %1231 = vst [vmem:[#allocation1 + $0x23] ss:$4 sm:$0xff] %v1165_v57 }
  0xb5   : > { %v253_v58 = vpop.trf.xlu0  ;;  %v285_v59 = vpop.trf.xlu1 }
  0xb6   : > { %v1161_v60 = vrot.slane %v253_v58, 2  ;;  %v1162_v61 = vrot.slane %v253_v58, 4  ;;  %1217 = vst [vmem:[#allocation1] ss:$4 sm:$0xff] %v253_v58  ;;  %v1163_v62 = vrot.slane %v285_v59, 2  ;;  %v1164_v63 = vrot.slane %v285_v59, 4 }
  0xb7   : > { %1223 = vst [vmem:[#allocation1 + $0x3] ss:$4 sm:$0xff] %v285_v59 }
  0xb8   : > { %1219 = vst [vmem:[#allocation1 + $0x1] ss:$4 sm:$0xff] %v1161_v60 }
  0xb9   : > { %1221 = vst [vmem:[#allocation1 + $0x2] ss:$4 sm:$0xff] %v1162_v61 }
  0xba   : > { %1225 = vst [vmem:[#allocation1 + $0x20] ss:$4 sm:$0xff] %v1163_v62 }
  0xbb   : > { %1227 = vst [vmem:[#allocation1 + $0x21] ss:$4 sm:$0xff] %v1164_v63  ;;  %v445_v7 = vpop.trf.xlu2 }
  0xbc   : > { %v1173_v8 = vrot.slane %v445_v7, 2  ;;  %v1174_v20 = vrot.slane %v445_v7, 4 }
  0xc0   : > { %v1752_v1 = vld.sshfl [vmem:[#allocation1] sm:$0xff pattern:$0x73625140] }
  0xc1   : > { %1234 = vst [vmem:[#allocation1] ss:$4 sm:$0xff] %v1166_v0 }
  0xc2   : > { %v1754_v2 = vld.sshfl [vmem:[#allocation1 + $0x20] sm:$0xff pattern:$0x73625140] }
  0xc5   : > { %v349_v3 = vpop.trf.xlu0  ;;  %v413_v6 = vpop.trf.xlu1 }
  0xc6   : > { %v1167_v4 = vrot.slane %v349_v3, 2  ;;  %v1168_v5 = vrot.slane %v349_v3, 4  ;;  %1235 = vst [vmem:[#allocation1 + $0x1] ss:$4 sm:$0xff] %v349_v3  ;;  %v1171_v9 = vrot.slane %v413_v6, 2  ;;  %v1172_v11 = vrot.slane %v413_v6, 4 }
  0xc7   : > { %1241 = vst [vmem:[#allocation1 + $0x23] ss:$4 sm:$0xff] %v413_v6 }
  0xc8   : > { %1237 = vst [vmem:[#allocation1 + $0x3] ss:$4 sm:$0xff] %v1168_v5 }
  0xc9   : > { %1236 = vst [vmem:[#allocation1 + $0x2] ss:$4 sm:$0xff] %v1167_v4 }
  0xcb   : > { %v541_v18 = vpop.trf.xlu2 }
  0xcc   : > { %v1180_v31 = vrot.slane %v541_v18, 4  ;;  %v1179_v32 = vrot.slane %v541_v18, 2 }
  0xd0   : > { %v1756_v10 = vld.sshfl [vmem:[#allocation1] sm:$0xff pattern:$0x73625140] }
  0xd1   : > { %1246 = vst [vmem:[#allocation1 + $0x2] ss:$4 sm:$0xff] %v445_v7 }
  0xd2   : > { %1247 = vst [vmem:[#allocation1 + $0x3] ss:$4 sm:$0xff] %v1173_v8 }
  0xd3   : > { %1244 = vst [vmem:[#allocation1] ss:$4 sm:$0xff] %v1171_v9 }
  0xd4   : > { %1245 = vst [vmem:[#allocation1 + $0x1] ss:$4 sm:$0xff] %v1172_v11 }
  0xd5   : > { %v381_v12 = vpop.trf.xlu0  ;;  %v509_v15 = vpop.trf.xlu1 }
  0xd6   : > { %v1169_v13 = vrot.slane %v381_v12, 2  ;;  %v1170_v14 = vrot.slane %v381_v12, 4  ;;  %1238 = vst [vmem:[#allocation1 + $0x20] ss:$4 sm:$0xff] %v381_v12  ;;  %v1177_v16 = vrot.slane %v509_v15, 2  ;;  %v1178_v19 = vrot.slane %v509_v15, 4 }
  0xd8   : > { %1239 = vst [vmem:[#allocation1 + $0x21] ss:$4 sm:$0xff] %v1169_v13 }
  0xd9   : > { %1240 = vst [vmem:[#allocation1 + $0x22] ss:$4 sm:$0xff] %v1170_v14 }
  0xdb   : > { %v1758_v17 = vld.sshfl [vmem:[#allocation1] sm:$0xff pattern:$0x73625140]  ;;  %v605_v25 = vpop.trf.xlu2 }
  0xdc   : > { %1257 = vst [vmem:[#allocation1 + $0x3] ss:$4 sm:$0xff] %v541_v18  ;;  %v1183_v27 = vrot.slane %v605_v25, 2  ;;  %v1184_v28 = vrot.slane %v605_v25, 4 }
  0xdd   : > { %1254 = vst [vmem:[#allocation1] ss:$4 sm:$0xff] %v509_v15 }
  0xde   : > { %1255 = vst [vmem:[#allocation1 + $0x1] ss:$4 sm:$0xff] %v1177_v16 }
  0xdf   : > { %1256 = vst [vmem:[#allocation1 + $0x2] ss:$4 sm:$0xff] %v1178_v19 }
  0xe0   : > { %v1760_v21 = vld.sshfl [vmem:[#allocation1 + $0x20] sm:$0xff pattern:$0x73625140] }
  0xe1   : > { %1248 = vst [vmem:[#allocation1 + $0x20] ss:$4 sm:$0xff] %v1174_v20 }
  0xe5   : > { %v477_v22 = vpop.trf.xlu0  ;;  %v573_v29 = vpop.trf.xlu1 }
  0xe6   : > { %v1175_v23 = vrot.slane %v477_v22, 2  ;;  %v1176_v24 = vrot.slane %v477_v22, 4  ;;  %v1762_v26 = vld.sshfl [vmem:[#allocation1] sm:$0xff pattern:$0x73625140]  ;;  %v1182_v30 = vrot.slane %v573_v29, 4 }
  0xe7   : > { %1249 = vst [vmem:[#allocation1 + $0x21] ss:$4 sm:$0xff] %v477_v22  ;;  %v1181_v34 = vrot.slane %v573_v29, 2 }
  0xe8   : > { %1250 = vst [vmem:[#allocation1 + $0x22] ss:$4 sm:$0xff] %v1175_v23 }
  0xe9   : > { %1251 = vst [vmem:[#allocation1 + $0x23] ss:$4 sm:$0xff] %v1176_v24 }
  0xea   : > { %1265 = vst [vmem:[#allocation1 + $0x1] ss:$4 sm:$0xff] %v605_v25 }
  0xeb   : > { %1266 = vst [vmem:[#allocation1 + $0x2] ss:$4 sm:$0xff] %v1183_v27  ;;  %v637_v38 = vpop.trf.xlu2 }
  0xec   : > { %1267 = vst [vmem:[#allocation1 + $0x3] ss:$4 sm:$0xff] %v1184_v28  ;;  %v1185_v42 = vrot.slane %v637_v38, 2  ;;  %v1186_v43 = vrot.slane %v637_v38, 4 }
  0xed   : > { %1264 = vst [vmem:[#allocation1] ss:$4 sm:$0xff] %v1182_v30 }
  0xf0   : > { %v1764_v33 = vld.sshfl [vmem:[#allocation1 + $0x20] sm:$0xff pattern:$0x73625140] }
  0xf1   : > { %1259 = vst [vmem:[#allocation1 + $0x21] ss:$4 sm:$0xff] %v1180_v31 }
  0xf2   : > { %1258 = vst [vmem:[#allocation1 + $0x20] ss:$4 sm:$0xff] %v1179_v32 }
  0xf3   : > { %1260 = vst [vmem:[#allocation1 + $0x22] ss:$4 sm:$0xff] %v573_v29 }
  0xf4   : > { %1261 = vst [vmem:[#allocation1 + $0x23] ss:$4 sm:$0xff] %v1181_v34  ;;  %v1766_v35 = vld.sshfl [vmem:[#allocation1] sm:$0xff pattern:$0x73625140] }
  0xf5   : > { %v701_v36 = vpop.trf.xlu1  ;;  %v669_v37 = vpop.trf.xlu0 }
  0xf6   : > { %v1189_v39 = vrot.slane %v701_v36, 2  ;;  %1276 = vst [vmem:[#allocation1 + $0x2] ss:$4 sm:$0xff] %v701_v36  ;;  %v1187_v40 = vrot.slane %v669_v37, 2  ;;  %v1188_v41 = vrot.slane %v669_v37, 4  ;;  %v1190_v46 = vrot.slane %v701_v36, 4 }
  0xf8   : > { %1277 = vst [vmem:[#allocation1 + $0x3] ss:$4 sm:$0xff] %v1189_v39 }
  0xf9   : > { %1274 = vst [vmem:[#allocation1] ss:$4 sm:$0xff] %v1187_v40 }
  0xfa   : > { %1275 = vst [vmem:[#allocation1 + $0x1] ss:$4 sm:$0xff] %v1188_v41  ;;  %v1352_v41 = vpack.c.bf16 %v1764_v33, %v1758_v17  ;;  %v1583_v17 = vld [vmem:[%s1844_s1 + $0x4] sm:$0xf0]  ;;  %v1563_v33 = vld [vmem:[%s1844_s1 + $0x10] sm:$0xf] }
  0xfb   : > { %v1768_v44 = vld.sshfl [vmem:[#allocation1 + $0x20] sm:$0xff pattern:$0x73625140]  ;;  %v733_v45 = vpop.trf.xlu2 }
  0xfc   : > { %1268 = vst [vmem:[#allocation1 + $0x20] ss:$4 sm:$0xff] %v637_v38  ;;  %v1191_v47 = vrot.slane %v733_v45, 2  ;;  %v1192_v49 = vrot.slane %v733_v45, 4  ;;  %v1353_v40 = vpack.c.bf16 %v1768_v44, %v1762_v26  ;;  %v1351_v26 = vpack.c.bf16 %v1760_v21, %v1756_v10  ;;  %v1555_v44 = vld [vmem:[%s1844_s1] sm:$0xf] }
  0xfd   : > { %1269 = vst [vmem:[#allocation1 + $0x21] ss:$4 sm:$0xff] %v1185_v42  ;;  %v1350_v10 = vpack.c.bf16 %v1754_v2, %v1752_v1  ;;  %v1556_v21 = vor.u32 %v1583_v17, %v1555_v44 }
  0xfe   : > { %1270 = vst [vmem:[#allocation1 + $0x22] ss:$4 sm:$0xff] %v1186_v43 }
  0xff   : > { %1271 = vst [vmem:[#allocation1 + $0x23] ss:$4 sm:$0xff] %v669_v37 }
 0x101   : > { %v1772_v50 = vld.sshfl [vmem:[#allocation1] sm:$0xff pattern:$0x73625140] }
 0x105   : > { %v765_v51 = vpop.trf.xlu0  ;;  %v797_v53 = vpop.trf.xlu1 }
 0x106   : > { %v1770_v48 = vld.sshfl [vmem:[#allocation1 + $0x20] sm:$0xff pattern:$0x73625140]  ;;  %v1193_v52 = vrot.slane %v765_v51, 2  ;;  %v1194_v54 = vrot.slane %v765_v51, 4  ;;  %v1195_v55 = vrot.slane %v797_v53, 2 }
 0x107   : > { %1278 = vst [vmem:[#allocation1 + $0x20] ss:$4 sm:$0xff] %v1190_v46  ;;  %v1196_v56 = vrot.slane %v797_v53, 4  ;;  %v1354_v32 = vpack.c.bf16 %v1770_v48, %v1766_v35  ;;  %v1587_v48 = vld [vmem:[%s1844_s1 + $0x24] sm:$0xf0] }
 0x108   : > { %1279 = vst [vmem:[#allocation1 + $0x21] ss:$4 sm:$0xff] %v733_v45  ;;  %v1585_v45 = vld [vmem:[%s1844_s1 + $0x14] sm:$0xf0] }
 0x109   : > { %1280 = vst [vmem:[#allocation1 + $0x22] ss:$4 sm:$0xff] %v1191_v47  ;;  %v1564_v46 = vor.u32 %v1585_v45, %v1563_v33  ;;  %v1571_v47 = vld [vmem:[%s1844_s1 + $0x20] sm:$0xf] }
 0x10a   : > { %1281 = vst [vmem:[#allocation1 + $0x23] ss:$4 sm:$0xff] %v1192_v49 }
 0x10b   : > { %1287 = vst [vmem:[#allocation1 + $0x3] ss:$4 sm:$0xff] %v797_v53  ;;  %v925_v3 = vpop.trf.xlu2  ;;  %v1582_v53 = vld [vmem:[%s1844_s1 + $0x4] sm:$0xf] }
 0x10c   : > { %1284 = vst [vmem:[#allocation1] ss:$4 sm:$0xff] %v765_v51  ;;  %v1204_v4 = vrot.slane %v925_v3, 4  ;;  %v1203_v5 = vrot.slane %v925_v3, 2 }
 0x10d   : > { %1285 = vst [vmem:[#allocation1 + $0x1] ss:$4 sm:$0xff] %v1193_v52 }
 0x10e   : > { %1286 = vst [vmem:[#allocation1 + $0x2] ss:$4 sm:$0xff] %v1194_v54  ;;  %v1557_v54 = vld [vmem:[%s1844_s1 + $0x8] sm:$0xf0] }
 0x111   : > { %v1283_v57 = vld.sshfl [vmem:[#allocation1 + $0x20] sm:$0xff pattern:$0x73625140] }
 0x112   : > { %1288 = vst [vmem:[#allocation1 + $0x20] ss:$4 sm:$0xff] %v1195_v55  ;;  %v1355_v29 = vpack.c.bf16 %v1283_v57, %v1772_v50  ;;  %v1572_v50 = vor.u32 %v1587_v48, %v1571_v47  ;;  %v1584_v57 = vld [vmem:[%s1844_s1 + $0x14] sm:$0xf] }
 0x113   : > { %1289 = vst [vmem:[#allocation1 + $0x21] ss:$4 sm:$0xff] %v1196_v56  ;;  %v1560_v56 = vor.u32 %v1582_v53, %v1557_v54 }
 0x115   : > { %v1292_v58 = vld.sshfl [vmem:[#allocation1] sm:$0xff pattern:$0x73625140]  ;;  %v861_v59 = vpop.trf.xlu1  ;;  %v829_v60 = vpop.trf.xlu0 }
 0x116   : > { %v1199_v61 = vrot.slane %v861_v59, 2  ;;  %v1200_v62 = vrot.slane %v861_v59, 4  ;;  %1295 = vst [vmem:[#allocation1 + $0x1] ss:$4 sm:$0xff] %v861_v59  ;;  %v1197_v63 = vrot.slane %v829_v60, 2  ;;  %v1198_v0 = vrot.slane %v829_v60, 4 }
 0x117   : > { %1290 = vst [vmem:[#allocation1 + $0x22] ss:$4 sm:$0xff] %v829_v60  ;;  %v1586_v60 = vld [vmem:[%s1844_s1 + $0x24] sm:$0xf] }
 0x118   : > { %1296 = vst [vmem:[#allocation1 + $0x2] ss:$4 sm:$0xff] %v1199_v61  ;;  %v1573_v61 = vld [vmem:[%s1844_s1 + $0x28] sm:$0xf0] }
 0x119   : > { %1297 = vst [vmem:[#allocation1 + $0x3] ss:$4 sm:$0xff] %v1200_v62  ;;  %v1576_v62 = vor.u32 %v1586_v60, %v1573_v61 }
 0x11a   : > { %1291 = vst [vmem:[#allocation1 + $0x23] ss:$4 sm:$0xff] %v1197_v63 }
 0x11b   : > { %1294 = vst [vmem:[#allocation1] ss:$4 sm:$0xff] %v1198_v0  ;;  %v1021_v15 = vpop.trf.xlu2 }
 0x11c   : > { %v1209_v16 = vrot.slane %v1021_v15, 2  ;;  %v1210_v19 = vrot.slane %v1021_v15, 4 }
 0x121   : > { %v1293_v6 = vld.sshfl [vmem:[#allocation1 + $0x20] sm:$0xff pattern:$0x73625140] }
 0x122   : > { %1301 = vst [vmem:[#allocation1 + $0x23] ss:$4 sm:$0xff] %v925_v3  ;;  %v1302_v7 = vld.sshfl [vmem:[#allocation1] sm:$0xff pattern:$0x73625140]  ;;  %v1356_v24 = vpack.c.bf16 %v1293_v6, %v1292_v58 }
 0x123   : > { %1305 = vst [vmem:[#allocation1 + $0x1] ss:$4 sm:$0xff] %v1204_v4  ;;  %v1565_v58 = vld [vmem:[%s1844_s1 + $0x18] sm:$0xf0] }
 0x124   : > { %1304 = vst [vmem:[#allocation1] ss:$4 sm:$0xff] %v1203_v5  ;;  %v1568_v59 = vor.u32 %v1584_v57, %v1565_v58 }
 0x125   : > { %v893_v8 = vpop.trf.xlu1  ;;  %v957_v9 = vpop.trf.xlu0 }
 0x126   : > { %v1201_v11 = vrot.slane %v893_v8, 2  ;;  %v1202_v12 = vrot.slane %v893_v8, 4  ;;  %1298 = vst [vmem:[#allocation1 + $0x20] ss:$4 sm:$0xff] %v893_v8  ;;  %v1205_v13 = vrot.slane %v957_v9, 2  ;;  %v1206_v14 = vrot.slane %v957_v9, 4 }
 0x127   : > { %1306 = vst [vmem:[#allocation1 + $0x2] ss:$4 sm:$0xff] %v957_v9 }
 0x128   : > { %1299 = vst [vmem:[#allocation1 + $0x21] ss:$4 sm:$0xff] %v1201_v11 }
 0x129   : > { %1300 = vst [vmem:[#allocation1 + $0x22] ss:$4 sm:$0xff] %v1202_v12 }
 0x12a   : > { %1307 = vst [vmem:[#allocation1 + $0x3] ss:$4 sm:$0xff] %v1205_v13 }
 0x12b   : > { %v1085_v30 = vpop.trf.xlu2 }
 0x12c   : > { %v1214_v31 = vrot.slane %v1085_v30, 4  ;;  %v1213_v34 = vrot.slane %v1085_v30, 2 }
 0x130   : > { %v1303_v18 = vld.sshfl [vmem:[#allocation1 + $0x20] sm:$0xff pattern:$0x73625140] }
 0x131   : > { %v1357_v20 = vpack.c.bf16 %v1303_v18, %v1302_v7  ;;  %1308 = vst [vmem:[#allocation1 + $0x20] ss:$4 sm:$0xff] %v1206_v14  ;;  %v1774_v22 = vld.sshfl [vmem:[#allocation1] sm:$0xff pattern:$0x73625140] }
 0x132   : > { %1314 = vst [vmem:[#allocation1] ss:$4 sm:$0xff] %v1021_v15 }
 0x133   : > { %1408 = vmatpush.bf16.msra.mxu0 %v1357_v20  ;;  %1588 = vmatpush.bf16.msra.mxu2 %v1357_v20  ;;  %1315 = vst [vmem:[#allocation1 + $0x1] ss:$4 sm:$0xff] %v1209_v16 }
 0x134   : > { %1589 = vmatpush.bf16.msra.mxu3 %v1357_v20  ;;  %1316 = vst [vmem:[#allocation1 + $0x2] ss:$4 sm:$0xff] %v1210_v19 }
 0x135   : > { %v989_v23 = vpop.trf.xlu1  ;;  %v1053_v25 = vpop.trf.xlu0 }
 0x136   : > { %v1207_v27 = vrot.slane %v989_v23, 2  ;;  %v1208_v28 = vrot.slane %v989_v23, 4  ;;  %1309 = vst [vmem:[#allocation1 + $0x21] ss:$4 sm:$0xff] %v989_v23  ;;  %v1211_v37 = vrot.slane %v1053_v25, 2  ;;  %v1212_v39 = vrot.slane %v1053_v25, 4 }
 0x137   : > { %1409 = vmatpush.bf16.msra.mxu0 %v1356_v24  ;;  %1590 = vmatpush.bf16.msra.mxu2 %v1356_v24  ;;  %1317 = vst [vmem:[#allocation1 + $0x3] ss:$4 sm:$0xff] %v1053_v25 }
 0x138   : > { %1310 = vst [vmem:[#allocation1 + $0x22] ss:$4 sm:$0xff] %v1207_v27  ;;  %1591 = vmatpush.bf16.msra.mxu3 %v1356_v24 }
 0x139   : > { %1311 = vst [vmem:[#allocation1 + $0x23] ss:$4 sm:$0xff] %v1208_v28 }
 0x13b   : > { %1410 = vmatpush.bf16.msra.mxu0 %v1355_v29  ;;  %1592 = vmatpush.bf16.msra.mxu2 %v1355_v29 }
 0x13c   : > { %1593 = vmatpush.bf16.msra.mxu3 %v1355_v29 }
 0x13e   : > { %v1322_v36 = vld.sshfl [vmem:[#allocation1] sm:$0xff pattern:$0x73625140] }
 0x13f   : > { %1324 = vst [vmem:[#allocation1] ss:$4 sm:$0xff] %v1214_v31  ;;  %1411 = vmatpush.bf16.msra.mxu0 %v1354_v32  ;;  %1594 = vmatpush.bf16.msra.mxu2 %v1354_v32 }
 0x140   : > { %v1313_v38 = vld.sshfl [vmem:[#allocation1 + $0x20] sm:$0xff pattern:$0x73625140]  ;;  %1595 = vmatpush.bf16.msra.mxu3 %v1354_v32 }
 0x141   : > { %1320 = vst [vmem:[#allocation1 + $0x22] ss:$4 sm:$0xff] %v1085_v30  ;;  %v1358_v55 = vpack.c.bf16 %v1313_v38, %v1774_v22 }
 0x142   : > { %1321 = vst [vmem:[#allocation1 + $0x23] ss:$4 sm:$0xff] %v1213_v34 }
 0x143   : > { %1318 = vst [vmem:[#allocation1 + $0x20] ss:$4 sm:$0xff] %v1211_v37  ;;  %1412 = vmatpush.bf16.msra.mxu0 %v1353_v40  ;;  %1596 = vmatpush.bf16.msra.mxu2 %v1353_v40 }
 0x144   : > { %1319 = vst [vmem:[#allocation1 + $0x21] ss:$4 sm:$0xff] %v1212_v39  ;;  %1597 = vmatpush.bf16.msra.mxu3 %v1353_v40 }
 0x145   : > { %v1117_v35 = vpop.trf.xlu0 }
 0x146   : > { %v1215_v42 = vrot.slane %v1117_v35, 2  ;;  %v1216_v43 = vrot.slane %v1117_v35, 4  ;;  %1325 = vst [vmem:[#allocation1 + $0x1] ss:$4 sm:$0xff] %v1117_v35 }
 0x147   : > { %1413 = vmatpush.bf16.msra.mxu0 %v1352_v41  ;;  %1598 = vmatpush.bf16.msra.mxu2 %v1352_v41 }
 0x148   : > { %1326 = vst [vmem:[#allocation1 + $0x2] ss:$4 sm:$0xff] %v1215_v42  ;;  %1599 = vmatpush.bf16.msra.mxu3 %v1352_v41 }
 0x149   : > { %1327 = vst [vmem:[#allocation1 + $0x3] ss:$4 sm:$0xff] %v1216_v43 }
 0x14b   : > { %1414 = vmatpush.bf16.msra.mxu0 %v1351_v26  ;;  %1600 = vmatpush.bf16.msra.mxu2 %v1351_v26  ;;  %v1323_v2 = vld.sshfl [vmem:[#allocation1 + $0x20] sm:$0xff pattern:$0x73625140] }
 0x14c   : > { %1601 = vmatpush.bf16.msra.mxu3 %v1351_v26  ;;  %v1359_v52 = vpack.c.bf16 %v1323_v2, %v1322_v36 }
 0x14f   : > { %1415 = vmatpush.bf16.msra.mxu0 %v1350_v10  ;;  %1602 = vmatpush.bf16.msra.mxu2 %v1350_v10 }
 0x150   : > { %1603 = vmatpush.bf16.msra.mxu3 %v1350_v10  ;;  %v1328_v49 = vld.sshfl [vmem:[#allocation1] sm:$0xff pattern:$0x73625140] }
 0x151   : > { %v1360_v51 = vpack.c.bf16 %v1328_v49, %v1328_v49 }
 0x152   : > { %1416 = vmatmul.bf16.vlgmr.msra.gmra.mxu0 %v1556_v21  ;;  %1421 = vmatmul.bf16.vlgmr.msra.gmra.mxu2 %v1564_v46 }
 0x153   : > { %v1406_v1 = vsel %vm1404_vm0, %v1360_v51, 0  ;;  %1426 = vmatmul.bf16.vlgmr.msra.gmra.mxu3 %v1572_v50 }
 0x154   : > { %1437 = vmatpush.bf16.msra.mxu1 %v1406_v1 }
 0x158   : > { %1438 = vmatpush.bf16.msra.mxu1 %v1359_v52 }
 0x15c   : > { %1439 = vmatpush.bf16.msra.mxu1 %v1358_v55 }
 0x15f   : > { %1577 = vmatmul.msk.bf16.vlgmr.msra.gmra.mxu1 %vm1394_vm1, %v1560_v56 }
 0x16f   : > { %1578 = vmatmul.msk.bf16.gmra.mxu1 %vm1394_vm1, %v1568_v59 }
 0x17f   : > { %1579 = vmatmul.msk.bf16.gmra.mxu1 %vm1394_vm1, %v1576_v62 }
 0x1cf   : > { %v1417_v63 = vpop.f32.mrf.mxu0 }
 0x1d5   : > { %v1422_v7 = vpop.f32.mrf.mxu2 }
 0x1d6   : > { %v1427_v14 = vpop.f32.mrf.mxu3 }
 0x1d7   : > { %v1419_v4 = vpop.f32.mrf.mxu0 }
 0x1dc   : > { %v1441_v0 = vpop.f32.mrf.mxu1 }
 0x1dd   : > { %v1442_v3 = vadd.f32 %v1441_v0, %v1417_v63  ;;  %v1424_v11 = vpop.f32.mrf.mxu2 }
 0x1de   : > { %v1429_v18 = vpop.f32.mrf.mxu3 }
 0x1df   : > { %1457 = vst.msk [vmem:[%s179_s20] sm:$0xff] %vm1456_vm2, %v1442_v3 }
 0x1e4   : > { %v1443_v5 = vpop.f32.mrf.mxu1 }
 0x1e5   : > { %v1444_v6 = vadd.f32 %v1443_v5, %v1419_v4 }
 0x1e7   : > { %1458 = vst.msk [vmem:[%s179_s20 + $0x8] sm:$0xff] %vm1456_vm2, %v1444_v6 }
 0x1ec   : > { %v1446_v8 = vpop.f32.mrf.mxu1 }
 0x1ed   : > { %v1447_v9 = vadd.f32 %v1446_v8, %v1422_v7 }
 0x1ef   : > { %1459 = vst.msk [vmem:[%s179_s20 + $0x10] sm:$0xff] %vm1456_vm2, %v1447_v9 }
 0x1f4   : > { %v1448_v12 = vpop.f32.mrf.mxu1 }
 0x1f5   : > { %v1449_v13 = vadd.f32 %v1448_v12, %v1424_v11 }
 0x1f7   : > { %1460 = vst.msk [vmem:[%s179_s20 + $0x18] sm:$0xff] %vm1456_vm2, %v1449_v13 }
 0x1fc   : > { %v1451_v15 = vpop.f32.mrf.mxu1 }
 0x1fd   : > { %v1452_v16 = vadd.f32 %v1451_v15, %v1427_v14 }
 0x1ff   : > { %1461 = vst.msk [vmem:[%s179_s20 + $0x20] sm:$0xff] %vm1456_vm2, %v1452_v16 }
 0x204   : > { %v1453_v19 = vpop.f32.mrf.mxu1 }
 0x205   : > { %v1454_v20 = vadd.f32 %v1453_v19, %v1429_v18 }
 0x207   : > { %1462 = vst.msk [vmem:[%s179_s20 + $0x28] sm:$0xff] %vm1456_vm2, %v1454_v20 }
 0x208 PF: > { %s12_s11 = sadd.s32 1, %s1653_s11   ;;  %s1846_s9 = smov %s1649_s10 }
 0x209   : > { %p9_p5 = scmp.ge.s32.totalorder %s12_s11, 4   ;;  %s1847_s10 = smov %s1849_s12 }
 0x20b   :  { %11 = sbr.rel (!%p9_p5) target bundleno = 2 (0x2), region = 65 }

</bundles_post_ra>
